<compile_context>
chip_gen: v6e
topology: v6e:2x2x1
jax: 0.10.0
libtpu: 0.0.40
codegen_flags: <defaults>
</compile_context>

<pallas_src>
import math
import numpy as np
import jax
import jax.numpy as jnp
from jax.experimental import pallas as pl
from jax.experimental.pallas import tpu as pltpu


def _round_up(x, m):
    return ((x + m - 1) // m) * m


# ---------------------------------------------------------------------------
# roll-direction probe (cached; one tiny kernel per process, run before jit)
# ---------------------------------------------------------------------------
_ROLL_SIGN = None


def _roll_sign():
    global _ROLL_SIGN
    if _ROLL_SIGN is None:
        def k(x_ref, o_ref):
            o_ref[...] = pltpu.roll(x_ref[...], shift=1, axis=1)

        x = jnp.tile(jnp.arange(128, dtype=jnp.float32)[None, :], (8, 1))
        y = pl.pallas_call(
            k, out_shape=jax.ShapeDtypeStruct((8, 128), jnp.float32))(x)
        # jnp.roll convention: out[:, 1] == in[:, 0] == 0
        _ROLL_SIGN = 1 if float(y[0, 1]) == 0.0 else -1
    return _ROLL_SIGN


# ---------------------------------------------------------------------------
# in-kernel im2col for a 3x3 "same" conv; batch folded into the lane axis
# ---------------------------------------------------------------------------
_TAPS = [(dr, dc) for dr in (-1, 0, 1) for dc in (-1, 0, 1)]   # tap = kr*3 + kc


def _edge_masks(H, W, L):
    """Per-tap (1, L) f32 lane masks.  lane = n*H*W + r*W + c; masks zero the
    taps that fall outside each image (== zero padding=1) and also prevent the
    lane-roll from leaking across image boundaries when N is folded into L."""
    lane = jax.lax.broadcasted_iota(jnp.int32, (1, L), 1)
    p = lane % (H * W)
    row = p // W
    col = p - row * W
    top, bot = row >= 1, row <= H - 2
    left, right = col >= 1, col <= W - 2
    masks = []
    for dr, dc in _TAPS:
        m = None
        if dr == -1:
            m = top
        elif dr == 1:
            m = bot
        if dc == -1:
            m = left if m is None else jnp.logical_and(m, left)
        elif dc == 1:
            m = right if m is None else jnp.logical_and(m, right)
        masks.append(None if m is None else m.astype(jnp.float32))
    return masks


def _fill_patch(y, W, patch_ref, tap_stride, masks, roll_sign):
    """im2col: y (C, L) f32 -> 9 shifted/masked taps stored as bf16 at rows
    [tap*tap_stride, tap*tap_stride + C) of patch_ref (16-aligned offsets)."""
    C, L = y.shape
    for idx, (dr, dc) in enumerate(_TAPS):
        delta = dr * W + dc                       # want shifted[o] = y[o + delta]
        shift = (roll_sign * (-delta)) % L
        t = pltpu.roll(y, shift=shift, axis=1) if shift else y
        if masks[idx] is not None:
            t = t * masks[idx]
        patch_ref[idx * tap_stride:idx * tap_stride + C, :] = t.astype(jnp.bfloat16)


def _pool_matrix_2x2(H, W):
    """(H*W, Ho*Wo) matrix so that x @ P == AvgPool2d(2, 2) for one image."""
    Ho, Wo = H // 2, W // 2
    P = np.zeros((H * W, Ho * Wo), np.float32)
    for ho in range(Ho):
        for wo in range(Wo):
            o = ho * Wo + wo
            for dr in (0, 1):
                for dc in (0, 1):
                    P[(2 * ho + dr) * W + (2 * wo + dc), o] = 0.25
    return P


# ---------------------------------------------------------------------------
# fused dense-stage kernel
# ---------------------------------------------------------------------------

def dense_stage(x, layers, *, H, W, N, n_blk, is_last,
                init_w=None, bn_last=None, roll_sign=1):
    """One pallas_call for a whole dense block:
       [init 3x3 conv] -> layers x (BN+ReLU+1x1, BN+ReLU+grouped 3x3)
       -> AvgPool2d(2,2)  (not last)   or   BN+ReLU+avgpool+L2 head (last).

    x: (C_in, N*H*W) f32  (C_in = 3 when init_w is given).
    Returns (C_total, N*Ho*Wo) f32 for non-last stages, else (f_t, lf_t) each
    (C_total, N) f32 (transposed outside — tiny)."""
    HW = H * W
    L = N * HW
    assert L % n_blk == 0
    Lb = L // n_blk
    nb = N // n_blk                 # images per grid step
    nl = len(layers)
    has_init = init_w is not None
    if is_last:
        assert n_blk == 1

    c_in0 = layers[0]["in_ch"]
    c_total = layers[-1]["in_ch"] + layers[-1]["growth"]

    ts_init = _round_up(3, 16)
    ts_all = [ly["tap_stride"] for ly in layers] + ([ts_init] if has_init else [])
    patch_rows = 9 * max(ts_all)
    needs_clear = (has_init and ts_init > 3) or any(
        ly["tap_stride"] > ly["cmid"] for ly in layers)

    # ---- assemble args / in_specs --------------------------------------
    args = [x]
    in_specs = [pl.BlockSpec((x.shape[0], Lb), lambda i: (0, i))]
    if has_init:
        args.append(init_w)
        in_specs.append(pl.BlockSpec(init_w.shape, lambda i: (0, 0)))
    for ly in layers:
        for k in ("s1", "b1", "w1", "s2", "b2", "w2"):
            a = ly[k]
            args.append(a)
            in_specs.append(pl.BlockSpec(a.shape, lambda i: (0, 0)))
    if is_last:
        s_last, b_last = bn_last
        args += [s_last, b_last]
        in_specs += [pl.BlockSpec(s_last.shape, lambda i: (0, 0)),
                     pl.BlockSpec(b_last.shape, lambda i: (0, 0))]
        out_shape = (jax.ShapeDtypeStruct((c_total, N), jnp.float32),
                     jax.ShapeDtypeStruct((c_total, N), jnp.float32))
        out_specs = (pl.BlockSpec((c_total, N), lambda i: (0, 0)),
                     pl.BlockSpec((c_total, N), lambda i: (0, 0)))
    else:
        Ho, Wo = H // 2, W // 2
        pool = jnp.asarray(_pool_matrix_2x2(H, W), dtype=jnp.bfloat16)
        args.append(pool)
        in_specs.append(pl.BlockSpec(pool.shape, lambda i: (0, 0)))
        L_out = N * Ho * Wo
        out_shape = jax.ShapeDtypeStruct((c_total, L_out), jnp.float32)
        out_specs = pl.BlockSpec((c_total, L_out // n_blk), lambda i: (0, i))

    # ---- kernel body ----------------------------------------------------
    def kernel(*refs):
        pos = 0
        x_ref = refs[pos]; pos += 1
        wi_ref = None
        if has_init:
            wi_ref = refs[pos]; pos += 1
        lrefs = []
        for _ in range(nl):
            lrefs.append(refs[pos:pos + 6]); pos += 6
        if is_last:
            sl_ref, bl_ref = refs[pos:pos + 2]; pos += 2
            f_ref, lf_ref = refs[pos:pos + 2]; pos += 2
        else:
            pool_ref = refs[pos]; pos += 1
            out_ref = refs[pos]; pos += 1
        feat_ref, patch_ref = refs[pos], refs[pos + 1]

        # hoisted once per grid step; reused by every layer's im2col
        masks = _edge_masks(H, W, Lb)

        if needs_clear:
            # zero the padded (weight-column == 0) patch rows so stale VMEM
            # (possibly NaN bit patterns) never reaches the MXU
            patch_ref[...] = jnp.zeros_like(patch_ref)

        # prologue: stage input -> VMEM feature-map scratch
        if has_init:
            _fill_patch(x_ref[...], W, patch_ref, ts_init, masks, roll_sign)
            feat_ref[0:c_in0, :] = jnp.dot(
                wi_ref[...], patch_ref[0:9 * ts_init, :],
                preferred_element_type=jnp.float32)
        else:
            feat_ref[0:c_in0, :] = x_ref[...]

        # dense layers: each reads feat[:in_ch] and appends its growth channels
        for j in range(nl):
            s1, b1, w1, s2, b2, w2 = lrefs[j]
            in_ch = layers[j]["in_ch"]
            g = layers[j]["growth"]
            ts = layers[j]["tap_stride"]
            y = jnp.maximum(feat_ref[0:in_ch, :] * s1[...] + b1[...], 0.0)
            mid = jnp.dot(w1[...], y.astype(jnp.bfloat16),
                          preferred_element_type=jnp.float32)        # (cmid, Lb)
            z = jnp.maximum(mid * s2[...] + b2[...], 0.0)
            _fill_patch(z, W, patch_ref, ts, masks, roll_sign)
            feat_ref[in_ch:in_ch + g, :] = jnp.dot(
                w2[...], patch_ref[0:9 * ts, :],
                preferred_element_type=jnp.float32)                  # (g, Lb)

        # epilogue
        if is_last:
            # norm_last + relu_last + AvgPool2d(8) + eval-head L2 normalize
            yl = jnp.maximum(feat_ref[...] * sl_ref[...] + bl_ref[...], 0.0)
            cols = [jnp.sum(yl[:, n * HW:(n + 1) * HW], axis=1, keepdims=True)
                    * (1.0 / HW) for n in range(nb)]
            f_t = cols[0] if nb == 1 else jnp.concatenate(cols, axis=1)
            f_ref[...] = f_t
            ss = jnp.sum(f_t * f_t, axis=0, keepdims=True)
            lf_ref[...] = f_t / jnp.sqrt(jnp.maximum(ss, 1e-12))
        else:
            HoWo = (H // 2) * (W // 2)
            for n in range(nb):
                out_ref[:, n * HoWo:(n + 1) * HoWo] = jnp.dot(
                    feat_ref[:, n * HW:(n + 1) * HW].astype(jnp.bfloat16),
                    pool_ref[...], preferred_element_type=jnp.float32)

    return pl.pallas_call(
        kernel,
        grid=(n_blk,),
        in_specs=in_specs,
        out_specs=out_specs,
        out_shape=out_shape,
        scratch_shapes=[pltpu.VMEM((c_total, Lb), jnp.float32),       # feature map
                        pltpu.VMEM((patch_rows, Lb), jnp.bfloat16)],  # im2col patch
        compiler_params=pltpu.CompilerParams(
            dimension_semantics=("parallel",)),
    )(*args)


# ---------------------------------------------------------------------------
# Parameter construction (matches the PyTorch __init__ init rules, eval mode)
# ---------------------------------------------------------------------------

def make_conv_weight_3x3(key, cout, cin, groups, tap_stride):
    """Conv2d 3x3 weight (normal(0, sqrt(2/(9*cout)))) as a dense
    (cout, 9*tap_stride) im2col matrix.  Column order [tap, cin] matches
    _fill_patch; grouped convs become block-diagonal; columns >= cin within a
    tap are zero padding (aligned tap stores)."""
    cin_g = cin // groups
    cout_g = cout // groups
    std = math.sqrt(2.0 / (9.0 * cout))
    w = np.asarray(std * jax.random.normal(key, (cout, cin_g, 3, 3),
                                           dtype=jnp.float32))
    dense = np.zeros((cout, 9, tap_stride), np.float32)
    for g in range(groups):
        for co in range(cout_g):
            oc = g * cout_g + co
            dense[oc, :, g * cin_g:(g + 1) * cin_g] = \
                w[oc].transpose(1, 2, 0).reshape(9, cin_g)
    return jnp.asarray(dense.reshape(cout, 9 * tap_stride))


def make_conv_weight_1x1(key, cout, cin):
    """LearnedGroupConv's underlying dense 1x1 conv (mask == ones at
    progress 0): normal(0, sqrt(2/cout)), shape (cout, cin)."""
    std = math.sqrt(2.0 / cout)
    return std * jax.random.normal(key, (cout, cin), dtype=jnp.float32)


def bn_params(c, eps=1e-5):
    """Eval-mode BatchNorm folded to (scale, shift), shaped (C, 1) so they
    broadcast along the lane axis.  Init: weight=1, bias=0, mean=0, var=1."""
    gamma = jnp.ones((c, 1), jnp.float32)
    beta = jnp.zeros((c, 1), jnp.float32)
    mean = jnp.zeros((c, 1), jnp.float32)
    var = jnp.ones((c, 1), jnp.float32)
    scale = gamma / jnp.sqrt(var + eps)
    shift = beta - mean * scale
    return scale, shift


def build_params(key, cfg):
    stages, growth = cfg["stages"], cfg["growth"]
    num_features = 2 * growth[0]
    key, k0 = jax.random.split(key)
    params = {
        # bf16 copies stored once (no per-forward casts)
        "init_w": make_conv_weight_3x3(k0, num_features, 3, groups=1,
                                       tap_stride=_round_up(3, 16)
                                       ).astype(jnp.bfloat16),
        "stages": [],
    }
    nf = num_features
    for i in range(len(stages)):
        st_layers = []
        for j in range(stages[i]):
            in_ch = nf + j * growth[i]
            cmid = cfg["bottleneck"] * growth[i]
            ts = _round_up(cmid, 16)
            key, k1, k2 = jax.random.split(key, 3)
            s1, b1 = bn_params(in_ch)
            s2, b2 = bn_params(cmid)
            st_layers.append(dict(
                in_ch=in_ch, cmid=cmid, growth=growth[i], tap_stride=ts,
                s1=s1, b1=b1,
                w1=make_conv_weight_1x1(k1, cmid, in_ch).astype(jnp.bfloat16),
                s2=s2, b2=b2,
                w2=make_conv_weight_3x3(k2, growth[i], cmid,
                                        groups=cfg["group_3x3"],
                                        tap_stride=ts).astype(jnp.bfloat16),
            ))
        params["stages"].append({"layers": st_layers})
        nf += stages[i] * growth[i]
    params["bn_last"] = bn_params(nf)
    params["num_features"] = nf
    # TODO(synk): the nn.Linear classifier only runs in training mode; the
    # eval-mode forward implemented here never calls it.
    return params


# ---------------------------------------------------------------------------
# Forward pass (3 pallas_calls total for a 3-stage config)
# ---------------------------------------------------------------------------

def condensenet_forward(x_nchw, params, cfg):
    assert cfg["group_1x1"] == cfg["condense_factor"], \
        "only the init_stride=1 / pool_size=8 configuration is implemented"
    stages = cfg["stages"]
    n_stages = len(stages)
    N, cin_img, H, W = x_nchw.shape
    assert (H >> (n_stages - 1)) == 8 and (W >> (n_stages - 1)) == 8, \
        "pool_last is AvgPool2d(8): final spatial size must be 8x8"
    sign = _roll_sign()

    # NCHW -> channel-major with the batch folded into the lane axis: (3, N*H*W)
    x = jnp.transpose(x_nchw.astype(jnp.float32), (1, 0, 2, 3)
                      ).reshape(cin_img, N * H * W)

    f_t = lf_t = None
    for si in range(n_stages):
        is_last = (si == n_stages - 1)
        HW = H * W
        HoWo = (H // 2) * (W // 2)
        # 2-way batch-split grid (keeps both v7x TensorCores busy) only when
        # both the input and pooled-output blocks stay 128-lane-dense.
        if (not is_last and N % 2 == 0
                and ((N // 2) * HW) % 128 == 0
                and ((N // 2) * HoWo) % 128 == 0):
            n_blk = 2
        else:
            n_blk = 1
        # TODO(synk): for ImageNet-scale inputs on v7x (64 MiB VMEM), add an
        # H-tile grid axis with a halo and an explicit vmem_limit_bytes; the
        # whole feature map per stage fits VMEM easily at CIFAR scale.
        out = dense_stage(
            x, params["stages"][si]["layers"], H=H, W=W, N=N, n_blk=n_blk,
            is_last=is_last,
            init_w=params["init_w"] if si == 0 else None,
            bn_last=params["bn_last"] if is_last else None,
            roll_sign=sign)
        if is_last:
            f_t, lf_t = out
        else:
            x = out
            H, W = H // 2, W // 2

    f = f_t.T                     # (N, C)   == x.view(N, -1)
    lf = lf_t.T[:, :, None]       # (N, C, 1) == normalized horizon_pool output
    return f, lf


# ---------------------------------------------------------------------------

if __name__ == "__main__":
    # small CondenseNet config (CIFAR-style: group_1x1 == condense_factor
    # -> init stride 1, final pool 8; 32x32 input is the minimum that config
    # supports, batch 2)
    cfg = dict(
        stages=[1, 1, 1],
        growth=[4, 4, 4],
        bottleneck=4,
        group_1x1=4,
        group_3x3=4,
        condense_factor=4,
        dropout_rate=0.0,
    )
    key = jax.random.PRNGKey(0)
    kx, kp = jax.random.split(key)
    x = jax.random.normal(kx, (2, 3, 32, 32), dtype=jnp.float32)  # NCHW like PyTorch
    params = build_params(kp, cfg)

    _roll_sign()                      # resolve rotate convention once, pre-jit
    fwd = jax.jit(lambda inp: condensenet_forward(inp, params, cfg))
    f, lf = fwd(x)
    jax.block_until_ready((f, lf))

    assert f.shape == (2, params["num_features"])
    assert lf.shape == (2, params["num_features"], 1)
    assert bool(jnp.all(jnp.isfinite(f))) and bool(jnp.all(jnp.isfinite(lf)))
    print("KERNEL_OK")
</pallas_src>

<mosaic_0001>
module attributes {stable_mosaic.version = 11 : i64} {
  func.func @k(%arg0: memref<8x128xf32, #tpu.memory_space<vmem>>, %arg1: memref<8x128xf32, #tpu.memory_space<vmem>>) attributes {dimension_semantics = [], scalar_prefetch = 0 : i64, scratch_operands = 0 : i64, tpu.core_type = #tpu.core_type<tc>} {
    %c0 = arith.constant 0 : index
    %c0_0 = arith.constant 0 : index
    %0 = vector.load %arg0[%c0, %c0_0] : memref<8x128xf32, #tpu.memory_space<vmem>>, vector<8x128xf32>
    %c1_i32 = arith.constant 1 : i32
    %1 = tpu.dynamic_rotate %0 by %c1_i32 dim 1 : vector<8x128xf32>, i32 -> vector<8x128xf32>
    %c0_1 = arith.constant 0 : index
    %c0_2 = arith.constant 0 : index
    %2 = vector.load %arg1[%c0_1, %c0_2] : memref<8x128xf32, #tpu.memory_space<vmem>>, vector<8x128xf32>
    tpu.vector_store %arg1[%c0_1, %c0_2], %1 {strides = array<i32>} : memref<8x128xf32, #tpu.memory_space<vmem>>, vector<8x128xf32>,
    return
  }
}

</mosaic_0001>

<bundles_post_ra>
// kernel: tpu_custom_call.1
= control target key start
LH: loop header
LB: loop body
LE: loop exit
PB: predicated region body
PF: predicated region fallthrough
CT: control target
= control target key end

     0   :  { %6 = vsyncpa [#allocation3], 0  ;;  %s106_s0 = inlined_call_operand.hbm [shape: f32[8,128], index: 0, kind: input, shape index: {}]   ;;  %s107_s1 = inlined_call_operand.hbm [shape: f32[8,128], index: 1, kind: output, shape index: {}]  }
   0x1   :  { %7 = vsyncpa [#allocation4], 0  ;;  %s87_s6 = smov [#allocation2]  }
   0x2   :  { %s14_s7 = sshll.u32 %s87_s6, 4  ;;  %s15_s7 = int_to_ptr.vmem [resolvable:$true] %s14_s7 }
   0x3   :  { %s51_s8 = scalar_lea.vmem %s15_s7, 128  ;;  %p56_p1 = scmp.lt.s32.totalorder %s15_s7, %s15_s7 }
   0x4   :  { %p52_p0 = scmp.ne.s32.totalorder %s15_s7, %s51_s8  ;;  %p57_p2 = scmp.lt.s32.totalorder %s51_s8, %s51_s8 }
   0x6   :  { %p58_p3 = por %p57_p2, %p56_p1 }
   0x8   :  { %p59_p4 = pnand %p58_p3, %p52_p0 }
   0xa   :  { %62 = shalt.err (!%p59_p4)
}
   0xb   :  { %17 = dma.hbm_to_vmem [thread:$0]  %s106_s0, 128, %s15_s7, [#allocation3]  }
   0xc   :  { %83 = dma.done.wait [#allocation3], 128  }
   0xd   :  { %84 = vsyncadd [#allocation3], 4294967168  ;;  %v21_v0 = vld [vmem:[#allocation2] sm:$0xff]  ;;  %s88_s11 = smov 1   ;;  %s89_s12 = smov [#allocation5]  }
   0xe   :  { %22 = vrot.lane.b32.xlu0 %v21_v0, %s88_s11  ;;  %s31_s13 = sshll.u32 %s89_s12, 4  ;;  %s32_s13 = int_to_ptr.vmem [resolvable:$true] %s31_s13 }
   0xf   :  { %s63_s14 = scalar_lea.vmem %s32_s13, 128  ;;  %p68_p6 = scmp.lt.s32.totalorder %s32_s13, %s32_s13 }
  0x10   :  { %p64_p5 = scmp.ne.s32.totalorder %s32_s13, %s63_s14  ;;  %p69_p7 = scmp.lt.s32.totalorder %s63_s14, %s63_s14 }
  0x12   :  { %p70_p8 = por %p69_p7, %p68_p6 }
  0x14   :  { %p71_p9 = pnand %p70_p8, %p64_p5 }
  0x80   :  { %v23_v1 = vpop.permute.xlu0 %22 }
  0x81   :  { %24 = vst [vmem:[#allocation5] sm:$0xff] %v23_v1 }
  0x82   :  { %74 = shalt.err (!%p71_p9)
}
  0x83   :  { %34 = dma.vmem_to_hbm [thread:$0]  %s32_s13, 128, %s107_s1, [#allocation4]  }
  0x84   :  { %85 = dma.done.wait [#allocation4], 128  }
  0x85   :  { %86 = vsyncadd [#allocation4], 4294967168 }
  0x86   :  { %38 = vsyncpa [#allocation3], 1 }
  0x87   :  { %39 = vsyncpa [#allocation4], 1 }

</bundles_post_ra>
